<compile_context>
chip_gen: v6e
topology: v6e:2x2x1
jax: 0.10.0
libtpu: 0.0.40
codegen_flags: <defaults>
</compile_context>

<pallas_src>
import functools
import math

import jax
import jax.numpy as jnp
from jax import lax
from jax.experimental import pallas as pl
from jax.experimental.pallas import tpu as pltpu


def _mha_kernel(*refs, num_heads, d_k, with_mask):
    if with_mask:
        (q_ref, k_ref, v_ref, m_ref,
         wq_ref, wk_ref, wv_ref, wo_ref,
         bq_ref, bk_ref, bv_ref, bo_ref, o_ref) = refs
    else:
        (q_ref, k_ref, v_ref,
         wq_ref, wk_ref, wv_ref, wo_ref,
         bq_ref, bk_ref, bv_ref, bo_ref, o_ref) = refs
        m_ref = None

    x_q = q_ref[0]          # (S, D)
    x_k = k_ref[0]
    x_v = v_ref[0]
    seq, d_model = x_q.shape

    scale = jnp.float32(1.0 / math.sqrt(d_k))
    neg_big = jnp.float32(-1e9)

    # Input projections on the MXU, f32 accumulation.  Fold the softmax scale
    # into Q once (S*D elements) rather than into every (S,S) score tile.
    q = (jnp.dot(x_q, wq_ref[...], preferred_element_type=jnp.float32)
         + bq_ref[...]) * scale
    k = jnp.dot(x_k, wk_ref[...], preferred_element_type=jnp.float32) + bk_ref[...]
    v = jnp.dot(x_v, wv_ref[...], preferred_element_type=jnp.float32) + bv_ref[...]

    wo = wo_ref[...]

    if with_mask:
        # Hoist the compare out of the per-head loop; exact masked_fill(-1e9)
        # semantics are preserved by the select below.
        mask_zero = m_ref[0] == 0

    # Output accumulator starts at the output-projection bias.
    out = jnp.broadcast_to(bo_ref[...], (seq, d_model)).astype(jnp.float32)

    # num_heads is small and static -> fully unrolled (LLO sees everything).
    for h in range(num_heads):
        sl = slice(h * d_k, (h + 1) * d_k)
        qh = q[:, sl]                                  # (S, d_k)
        kh = k[:, sl]
        vh = v[:, sl]

        # q @ k^T as a contraction over d_k -> no explicit transpose of K.
        scores = lax.dot_general(
            qh, kh, dimension_numbers=(((1,), (1,)), ((), ())),
            preferred_element_type=jnp.float32)        # (S, S)
        if with_mask:
            scores = jnp.where(mask_zero, neg_big, scores)

        m_max = jnp.max(scores, axis=-1, keepdims=True)
        p = jnp.exp(scores - m_max)                    # EUP
        denom = jnp.sum(p, axis=-1, keepdims=True)     # XLU reduce
        attn = p * pl.reciprocal(denom, approx=True)   # EUP rcp (free slot)

        ctx_h = jnp.dot(attn, vh, preferred_element_type=jnp.float32)   # (S, d_k)
        # Output projection accumulated per head:
        #   ctx @ Wo == sum_h ctx_h @ Wo[h*d_k:(h+1)*d_k, :]
        out = out + jnp.dot(ctx_h, wo[sl, :], preferred_element_type=jnp.float32)

    o_ref[0] = out.astype(o_ref.dtype)


def multi_head_attention_forward(Q, K, V, params, num_heads, mask=None):
    """Pallas equivalent of MultiHeadAttention(d_model, num_heads).forward(Q, K, V, mask).

    params holds PyTorch-layout weights: w* of shape (out, in), b* of shape (out,).
    mask (optional) must be broadcastable to (B, S, S); entries == 0 are masked out.
    """
    B, S, D = Q.shape
    assert D % num_heads == 0
    d_k = D // num_heads

    # One-time host-side layout prep: (out, in) -> (in, out), biases -> (1, D).
    wq_t = params["wq"].T
    wk_t = params["wk"].T
    wv_t = params["wv"].T
    wo_t = params["wo"].T
    bq = params["bq"].reshape(1, D)
    bk = params["bk"].reshape(1, D)
    bv = params["bv"].reshape(1, D)
    bo = params["bo"].reshape(1, D)

    with_mask = mask is not None

    qkv_spec = pl.BlockSpec((1, S, D), lambda b: (b, 0, 0))
    w_spec = pl.BlockSpec((D, D), lambda b: (0, 0))    # resident across grid
    b_spec = pl.BlockSpec((1, D), lambda b: (0, 0))

    in_specs = [qkv_spec, qkv_spec, qkv_spec]
    inputs = [Q, K, V]
    if with_mask:
        mask_arr = jnp.broadcast_to(jnp.asarray(mask, dtype=jnp.float32), (B, S, S))
        in_specs.append(pl.BlockSpec((1, S, S), lambda b: (b, 0, 0)))
        inputs.append(mask_arr)
    in_specs += [w_spec, w_spec, w_spec, w_spec, b_spec, b_spec, b_spec, b_spec]
    inputs += [wq_t, wk_t, wv_t, wo_t, bq, bk, bv, bo]

    kernel = functools.partial(
        _mha_kernel, num_heads=num_heads, d_k=d_k, with_mask=with_mask)

    return pl.pallas_call(
        kernel,
        out_shape=jax.ShapeDtypeStruct((B, S, D), Q.dtype),
        grid=(B,),
        in_specs=in_specs,
        out_specs=pl.BlockSpec((1, S, D), lambda b: (b, 0, 0)),
        compiler_params=pltpu.CompilerParams(dimension_semantics=("parallel",)),
    )(*inputs)


def _reference(Q, K, V, params, num_heads, mask=None):
    """Pure-JAX reference matching the PyTorch module."""
    B, S, D = Q.shape
    d_k = D // num_heads
    hp = jax.lax.Precision.HIGHEST

    def linear(x, w, b):  # torch Linear: y = x @ w.T + b, w is (out, in)
        return jnp.einsum("bsd,ed->bse", x, w, precision=hp) + b

    q = linear(Q, params["wq"], params["bq"])
    k = linear(K, params["wk"], params["bk"])
    v = linear(V, params["wv"], params["bv"])

    def split(x):
        return x.reshape(B, S, num_heads, d_k).transpose(0, 2, 1, 3)

    qh, kh, vh = split(q), split(k), split(v)
    scores = jnp.einsum("bhqd,bhkd->bhqk", qh, kh, precision=hp) / math.sqrt(d_k)
    if mask is not None:
        m = jnp.broadcast_to(jnp.asarray(mask), (B, S, S))
        scores = jnp.where(m[:, None, :, :] == 0, -1e9, scores)
    attn = jax.nn.softmax(scores, axis=-1)
    ctx = jnp.einsum("bhqk,bhkd->bhqd", attn, vh, precision=hp)
    ctx = ctx.transpose(0, 2, 1, 3).reshape(B, S, D)
    return jnp.einsum("bsd,ed->bse", ctx, params["wo"], precision=hp) + params["bo"]


if __name__ == "__main__":
    batch, seq, d_model, num_heads = 2, 8, 32, 4

    key = jax.random.PRNGKey(0)
    keys = jax.random.split(key, 12)
    w_scale = 1.0 / math.sqrt(d_model)

    params = {
        "wq": jax.random.normal(keys[0], (d_model, d_model), jnp.float32) * w_scale,
        "wk": jax.random.normal(keys[1], (d_model, d_model), jnp.float32) * w_scale,
        "wv": jax.random.normal(keys[2], (d_model, d_model), jnp.float32) * w_scale,
        "wo": jax.random.normal(keys[3], (d_model, d_model), jnp.float32) * w_scale,
        "bq": jax.random.normal(keys[4], (d_model,), jnp.float32) * w_scale,
        "bk": jax.random.normal(keys[5], (d_model,), jnp.float32) * w_scale,
        "bv": jax.random.normal(keys[6], (d_model,), jnp.float32) * w_scale,
        "bo": jax.random.normal(keys[7], (d_model,), jnp.float32) * w_scale,
    }
    Q = jax.random.normal(keys[8], (batch, seq, d_model), jnp.float32)
    K = jax.random.normal(keys[9], (batch, seq, d_model), jnp.float32)
    V = jax.random.normal(keys[10], (batch, seq, d_model), jnp.float32)

    # Unmasked path.
    out = multi_head_attention_forward(Q, K, V, params, num_heads)
    out = jax.block_until_ready(out)
    ref = _reference(Q, K, V, params, num_heads)
    assert out.shape == (batch, seq, d_model), out.shape
    assert jnp.allclose(out, ref, atol=1e-2, rtol=1e-2), "mismatch vs reference (no mask)"

    # Masked (causal) path.
    causal = jnp.tril(jnp.ones((seq, seq), jnp.float32))
    mask = jnp.broadcast_to(causal, (batch, seq, seq))
    out_m = multi_head_attention_forward(Q, K, V, params, num_heads, mask=mask)
    out_m = jax.block_until_ready(out_m)
    ref_m = _reference(Q, K, V, params, num_heads, mask=mask)
    assert jnp.allclose(out_m, ref_m, atol=1e-2, rtol=1e-2), "mismatch vs reference (mask)"

    print("KERNEL_OK")
</pallas_src>

<mosaic_0001>
module attributes {stable_mosaic.version = 11 : i64} {
  func.func @_mha_kernel(%arg0: i32, %arg1: memref<1x8x32xf32, #tpu.memory_space<vmem>>, %arg2: memref<1x8x32xf32, #tpu.memory_space<vmem>>, %arg3: memref<1x8x32xf32, #tpu.memory_space<vmem>>, %arg4: memref<32x32xf32, #tpu.memory_space<vmem>>, %arg5: memref<32x32xf32, #tpu.memory_space<vmem>>, %arg6: memref<32x32xf32, #tpu.memory_space<vmem>>, %arg7: memref<32x32xf32, #tpu.memory_space<vmem>>, %arg8: memref<1x32xf32, #tpu.memory_space<vmem>>, %arg9: memref<1x32xf32, #tpu.memory_space<vmem>>, %arg10: memref<1x32xf32, #tpu.memory_space<vmem>>, %arg11: memref<1x32xf32, #tpu.memory_space<vmem>>, %arg12: memref<1x8x32xf32, #tpu.memory_space<vmem>>) attributes {dimension_semantics = [#tpu.dimension_semantics<parallel>], iteration_bounds = array<i64: 2>, scalar_prefetch = 0 : i64, scratch_operands = 0 : i64, tpu.core_type = #tpu.core_type<tc>, window_params = [{transform_indices = @transform_0, window_bounds = array<i64: 1, 8, 32>}, {transform_indices = @transform_1, window_bounds = array<i64: 1, 8, 32>}, {transform_indices = @transform_2, window_bounds = array<i64: 1, 8, 32>}, {pipeline_mode = #tpu.pipeline_mode<synchronous>, transform_indices = @transform_3, window_bounds = array<i64: 32, 32>}, {pipeline_mode = #tpu.pipeline_mode<synchronous>, transform_indices = @transform_4, window_bounds = array<i64: 32, 32>}, {pipeline_mode = #tpu.pipeline_mode<synchronous>, transform_indices = @transform_5, window_bounds = array<i64: 32, 32>}, {pipeline_mode = #tpu.pipeline_mode<synchronous>, transform_indices = @transform_6, window_bounds = array<i64: 32, 32>}, {pipeline_mode = #tpu.pipeline_mode<synchronous>, transform_indices = @transform_7, window_bounds = array<i64: 1, 32>}, {pipeline_mode = #tpu.pipeline_mode<synchronous>, transform_indices = @transform_8, window_bounds = array<i64: 1, 32>}, {pipeline_mode = #tpu.pipeline_mode<synchronous>, transform_indices = @transform_9, window_bounds = array<i64: 1, 32>}, {pipeline_mode = #tpu.pipeline_mode<synchronous>, transform_indices = @transform_10, window_bounds = array<i64: 1, 32>}, {transform_indices = @transform_11, window_bounds = array<i64: 1, 8, 32>}]} {
    %c0 = arith.constant 0 : index
    %c0_0 = arith.constant 0 : index
    %c0_1 = arith.constant 0 : index
    %0 = vector.load %arg1[%c0, %c0_0, %c0_1] : memref<1x8x32xf32, #tpu.memory_space<vmem>>, vector<1x8x32xf32>
    %1 = vector.shape_cast %0 : vector<1x8x32xf32> to vector<8x32xf32>
    %c0_2 = arith.constant 0 : index
    %c0_3 = arith.constant 0 : index
    %c0_4 = arith.constant 0 : index
    %2 = vector.load %arg2[%c0_2, %c0_3, %c0_4] : memref<1x8x32xf32, #tpu.memory_space<vmem>>, vector<1x8x32xf32>
    %3 = vector.shape_cast %2 : vector<1x8x32xf32> to vector<8x32xf32>
    %c0_5 = arith.constant 0 : index
    %c0_6 = arith.constant 0 : index
    %c0_7 = arith.constant 0 : index
    %4 = vector.load %arg3[%c0_5, %c0_6, %c0_7] : memref<1x8x32xf32, #tpu.memory_space<vmem>>, vector<1x8x32xf32>
    %5 = vector.shape_cast %4 : vector<1x8x32xf32> to vector<8x32xf32>
    %c0_8 = arith.constant 0 : index
    %c0_9 = arith.constant 0 : index
    %6 = vector.load %arg4[%c0_8, %c0_9] : memref<32x32xf32, #tpu.memory_space<vmem>>, vector<32x32xf32>
    %cst = arith.constant dense<0.000000e+00> : vector<8x32xf32>
    %7 = tpu.matmul %1, %6, %cst {dimension_numbers = #tpu.dot_dimension_numbers<[1], [0], [0], [1], [0, 0, 1, 1], [], []>} : vector<8x32xf32>, vector<32x32xf32>, vector<8x32xf32> -> vector<8x32xf32>
    %c0_10 = arith.constant 0 : index
    %c0_11 = arith.constant 0 : index
    %8 = vector.load %arg8[%c0_10, %c0_11] : memref<1x32xf32, #tpu.memory_space<vmem>>, vector<1x32xf32>
    %9 = vector.broadcast %8 : vector<1x32xf32> to vector<8x32xf32>
    %10 = arith.addf %7, %9 : vector<8x32xf32>
    %cst_12 = arith.constant 0.353553385 : f32
    %11 = vector.broadcast %cst_12 : f32 to vector<8x32xf32>
    %12 = arith.mulf %10, %11 : vector<8x32xf32>
    %c0_13 = arith.constant 0 : index
    %c0_14 = arith.constant 0 : index
    %13 = vector.load %arg5[%c0_13, %c0_14] : memref<32x32xf32, #tpu.memory_space<vmem>>, vector<32x32xf32>
    %cst_15 = arith.constant dense<0.000000e+00> : vector<8x32xf32>
    %14 = tpu.matmul %3, %13, %cst_15 {dimension_numbers = #tpu.dot_dimension_numbers<[1], [0], [0], [1], [0, 0, 1, 1], [], []>} : vector<8x32xf32>, vector<32x32xf32>, vector<8x32xf32> -> vector<8x32xf32>
    %c0_16 = arith.constant 0 : index
    %c0_17 = arith.constant 0 : index
    %15 = vector.load %arg9[%c0_16, %c0_17] : memref<1x32xf32, #tpu.memory_space<vmem>>, vector<1x32xf32>
    %16 = vector.broadcast %15 : vector<1x32xf32> to vector<8x32xf32>
    %17 = arith.addf %14, %16 : vector<8x32xf32>
    %c0_18 = arith.constant 0 : index
    %c0_19 = arith.constant 0 : index
    %18 = vector.load %arg6[%c0_18, %c0_19] : memref<32x32xf32, #tpu.memory_space<vmem>>, vector<32x32xf32>
    %cst_20 = arith.constant dense<0.000000e+00> : vector<8x32xf32>
    %19 = tpu.matmul %5, %18, %cst_20 {dimension_numbers = #tpu.dot_dimension_numbers<[1], [0], [0], [1], [0, 0, 1, 1], [], []>} : vector<8x32xf32>, vector<32x32xf32>, vector<8x32xf32> -> vector<8x32xf32>
    %c0_21 = arith.constant 0 : index
    %c0_22 = arith.constant 0 : index
    %20 = vector.load %arg10[%c0_21, %c0_22] : memref<1x32xf32, #tpu.memory_space<vmem>>, vector<1x32xf32>
    %21 = vector.broadcast %20 : vector<1x32xf32> to vector<8x32xf32>
    %22 = arith.addf %19, %21 : vector<8x32xf32>
    %c0_23 = arith.constant 0 : index
    %c0_24 = arith.constant 0 : index
    %23 = vector.load %arg7[%c0_23, %c0_24] : memref<32x32xf32, #tpu.memory_space<vmem>>, vector<32x32xf32>
    %c0_25 = arith.constant 0 : index
    %c0_26 = arith.constant 0 : index
    %24 = vector.load %arg11[%c0_25, %c0_26] : memref<1x32xf32, #tpu.memory_space<vmem>>, vector<1x32xf32>
    %25 = vector.shape_cast %24 : vector<1x32xf32> to vector<1x32xf32>
    %26 = vector.broadcast %25 : vector<1x32xf32> to vector<8x32xf32>
    %27 = vector.extract_strided_slice %12 {offsets = [0, 0], sizes = [8, 8], strides = [1, 1]} : vector<8x32xf32> to vector<8x8xf32>
    %28 = vector.extract_strided_slice %17 {offsets = [0, 0], sizes = [8, 8], strides = [1, 1]} : vector<8x32xf32> to vector<8x8xf32>
    %29 = vector.extract_strided_slice %22 {offsets = [0, 0], sizes = [8, 8], strides = [1, 1]} : vector<8x32xf32> to vector<8x8xf32>
    %cst_27 = arith.constant dense<0.000000e+00> : vector<8x8xf32>
    %30 = tpu.matmul %27, %28, %cst_27 {dimension_numbers = #tpu.dot_dimension_numbers<[1], [1], [0], [0], [0, 0, 1, 0], [], []>} : vector<8x8xf32>, vector<8x8xf32>, vector<8x8xf32> -> vector<8x8xf32>
    %cst_28 = arith.constant dense<0xFF800000> : vector<8xf32>
    %31 = vector.multi_reduction <maximumf>, %30, %cst_28 [1] : vector<8x8xf32> to vector<8xf32>
    %32 = vector.shape_cast %31 : vector<8xf32> to vector<8x1xf32>
    %33 = vector.broadcast %32 : vector<8x1xf32> to vector<8x8xf32>
    %34 = arith.subf %30, %33 : vector<8x8xf32>
    %35 = math.exp %34 : vector<8x8xf32>
    %cst_29 = arith.constant dense<0.000000e+00> : vector<8xf32>
    %36 = vector.multi_reduction <add>, %35, %cst_29 [1] : vector<8x8xf32> to vector<8xf32>
    %37 = vector.shape_cast %36 : vector<8xf32> to vector<8x1xf32>
    %38 = tpu.reciprocal %37 {approx = true} : vector<8x1xf32> -> vector<8x1xf32>
    %39 = vector.broadcast %38 : vector<8x1xf32> to vector<8x8xf32>
    %40 = arith.mulf %35, %39 : vector<8x8xf32>
    %cst_30 = arith.constant dense<0.000000e+00> : vector<8x8xf32>
    %41 = tpu.matmul %40, %29, %cst_30 {dimension_numbers = #tpu.dot_dimension_numbers<[1], [0], [0], [1], [0, 0, 1, 1], [], []>} : vector<8x8xf32>, vector<8x8xf32>, vector<8x8xf32> -> vector<8x8xf32>
    %42 = vector.extract_strided_slice %23 {offsets = [0, 0], sizes = [8, 32], strides = [1, 1]} : vector<32x32xf32> to vector<8x32xf32>
    %cst_31 = arith.constant dense<0.000000e+00> : vector<8x32xf32>
    %43 = tpu.matmul %41, %42, %cst_31 {dimension_numbers = #tpu.dot_dimension_numbers<[1], [0], [0], [1], [0, 0, 1, 1], [], []>} : vector<8x8xf32>, vector<8x32xf32>, vector<8x32xf32> -> vector<8x32xf32>
    %44 = arith.addf %26, %43 : vector<8x32xf32>
    %45 = vector.extract_strided_slice %12 {offsets = [0, 8], sizes = [8, 8], strides = [1, 1]} : vector<8x32xf32> to vector<8x8xf32>
    %46 = vector.extract_strided_slice %17 {offsets = [0, 8], sizes = [8, 8], strides = [1, 1]} : vector<8x32xf32> to vector<8x8xf32>
    %47 = vector.extract_strided_slice %22 {offsets = [0, 8], sizes = [8, 8], strides = [1, 1]} : vector<8x32xf32> to vector<8x8xf32>
    %cst_32 = arith.constant dense<0.000000e+00> : vector<8x8xf32>
    %48 = tpu.matmul %45, %46, %cst_32 {dimension_numbers = #tpu.dot_dimension_numbers<[1], [1], [0], [0], [0, 0, 1, 0], [], []>} : vector<8x8xf32>, vector<8x8xf32>, vector<8x8xf32> -> vector<8x8xf32>
    %cst_33 = arith.constant dense<0xFF800000> : vector<8xf32>
    %49 = vector.multi_reduction <maximumf>, %48, %cst_33 [1] : vector<8x8xf32> to vector<8xf32>
    %50 = vector.shape_cast %49 : vector<8xf32> to vector<8x1xf32>
    %51 = vector.broadcast %50 : vector<8x1xf32> to vector<8x8xf32>
    %52 = arith.subf %48, %51 : vector<8x8xf32>
    %53 = math.exp %52 : vector<8x8xf32>
    %cst_34 = arith.constant dense<0.000000e+00> : vector<8xf32>
    %54 = vector.multi_reduction <add>, %53, %cst_34 [1] : vector<8x8xf32> to vector<8xf32>
    %55 = vector.shape_cast %54 : vector<8xf32> to vector<8x1xf32>
    %56 = tpu.reciprocal %55 {approx = true} : vector<8x1xf32> -> vector<8x1xf32>
    %57 = vector.broadcast %56 : vector<8x1xf32> to vector<8x8xf32>
    %58 = arith.mulf %53, %57 : vector<8x8xf32>
    %cst_35 = arith.constant dense<0.000000e+00> : vector<8x8xf32>
    %59 = tpu.matmul %58, %47, %cst_35 {dimension_numbers = #tpu.dot_dimension_numbers<[1], [0], [0], [1], [0, 0, 1, 1], [], []>} : vector<8x8xf32>, vector<8x8xf32>, vector<8x8xf32> -> vector<8x8xf32>
    %60 = vector.extract_strided_slice %23 {offsets = [8, 0], sizes = [8, 32], strides = [1, 1]} : vector<32x32xf32> to vector<8x32xf32>
    %cst_36 = arith.constant dense<0.000000e+00> : vector<8x32xf32>
    %61 = tpu.matmul %59, %60, %cst_36 {dimension_numbers = #tpu.dot_dimension_numbers<[1], [0], [0], [1], [0, 0, 1, 1], [], []>} : vector<8x8xf32>, vector<8x32xf32>, vector<8x32xf32> -> vector<8x32xf32>
    %62 = arith.addf %44, %61 : vector<8x32xf32>
    %63 = vector.extract_strided_slice %12 {offsets = [0, 16], sizes = [8, 8], strides = [1, 1]} : vector<8x32xf32> to vector<8x8xf32>
    %64 = vector.extract_strided_slice %17 {offsets = [0, 16], sizes = [8, 8], strides = [1, 1]} : vector<8x32xf32> to vector<8x8xf32>
    %65 = vector.extract_strided_slice %22 {offsets = [0, 16], sizes = [8, 8], strides = [1, 1]} : vector<8x32xf32> to vector<8x8xf32>
    %cst_37 = arith.constant dense<0.000000e+00> : vector<8x8xf32>
    %66 = tpu.matmul %63, %64, %cst_37 {dimension_numbers = #tpu.dot_dimension_numbers<[1], [1], [0], [0], [0, 0, 1, 0], [], []>} : vector<8x8xf32>, vector<8x8xf32>, vector<8x8xf32> -> vector<8x8xf32>
    %cst_38 = arith.constant dense<0xFF800000> : vector<8xf32>
    %67 = vector.multi_reduction <maximumf>, %66, %cst_38 [1] : vector<8x8xf32> to vector<8xf32>
    %68 = vector.shape_cast %67 : vector<8xf32> to vector<8x1xf32>
    %69 = vector.broadcast %68 : vector<8x1xf32> to vector<8x8xf32>
    %70 = arith.subf %66, %69 : vector<8x8xf32>
    %71 = math.exp %70 : vector<8x8xf32>
    %cst_39 = arith.constant dense<0.000000e+00> : vector<8xf32>
    %72 = vector.multi_reduction <add>, %71, %cst_39 [1] : vector<8x8xf32> to vector<8xf32>
    %73 = vector.shape_cast %72 : vector<8xf32> to vector<8x1xf32>
    %74 = tpu.reciprocal %73 {approx = true} : vector<8x1xf32> -> vector<8x1xf32>
    %75 = vector.broadcast %74 : vector<8x1xf32> to vector<8x8xf32>
    %76 = arith.mulf %71, %75 : vector<8x8xf32>
    %cst_40 = arith.constant dense<0.000000e+00> : vector<8x8xf32>
    %77 = tpu.matmul %76, %65, %cst_40 {dimension_numbers = #tpu.dot_dimension_numbers<[1], [0], [0], [1], [0, 0, 1, 1], [], []>} : vector<8x8xf32>, vector<8x8xf32>, vector<8x8xf32> -> vector<8x8xf32>
    %78 = vector.extract_strided_slice %23 {offsets = [16, 0], sizes = [8, 32], strides = [1, 1]} : vector<32x32xf32> to vector<8x32xf32>
    %cst_41 = arith.constant dense<0.000000e+00> : vector<8x32xf32>
    %79 = tpu.matmul %77, %78, %cst_41 {dimension_numbers = #tpu.dot_dimension_numbers<[1], [0], [0], [1], [0, 0, 1, 1], [], []>} : vector<8x8xf32>, vector<8x32xf32>, vector<8x32xf32> -> vector<8x32xf32>
    %80 = arith.addf %62, %79 : vector<8x32xf32>
    %81 = vector.extract_strided_slice %12 {offsets = [0, 24], sizes = [8, 8], strides = [1, 1]} : vector<8x32xf32> to vector<8x8xf32>
    %82 = vector.extract_strided_slice %17 {offsets = [0, 24], sizes = [8, 8], strides = [1, 1]} : vector<8x32xf32> to vector<8x8xf32>
    %83 = vector.extract_strided_slice %22 {offsets = [0, 24], sizes = [8, 8], strides = [1, 1]} : vector<8x32xf32> to vector<8x8xf32>
    %cst_42 = arith.constant dense<0.000000e+00> : vector<8x8xf32>
    %84 = tpu.matmul %81, %82, %cst_42 {dimension_numbers = #tpu.dot_dimension_numbers<[1], [1], [0], [0], [0, 0, 1, 0], [], []>} : vector<8x8xf32>, vector<8x8xf32>, vector<8x8xf32> -> vector<8x8xf32>
    %cst_43 = arith.constant dense<0xFF800000> : vector<8xf32>
    %85 = vector.multi_reduction <maximumf>, %84, %cst_43 [1] : vector<8x8xf32> to vector<8xf32>
    %86 = vector.shape_cast %85 : vector<8xf32> to vector<8x1xf32>
    %87 = vector.broadcast %86 : vector<8x1xf32> to vector<8x8xf32>
    %88 = arith.subf %84, %87 : vector<8x8xf32>
    %89 = math.exp %88 : vector<8x8xf32>
    %cst_44 = arith.constant dense<0.000000e+00> : vector<8xf32>
    %90 = vector.multi_reduction <add>, %89, %cst_44 [1] : vector<8x8xf32> to vector<8xf32>
    %91 = vector.shape_cast %90 : vector<8xf32> to vector<8x1xf32>
    %92 = tpu.reciprocal %91 {approx = true} : vector<8x1xf32> -> vector<8x1xf32>
    %93 = vector.broadcast %92 : vector<8x1xf32> to vector<8x8xf32>
    %94 = arith.mulf %89, %93 : vector<8x8xf32>
    %cst_45 = arith.constant dense<0.000000e+00> : vector<8x8xf32>
    %95 = tpu.matmul %94, %83, %cst_45 {dimension_numbers = #tpu.dot_dimension_numbers<[1], [0], [0], [1], [0, 0, 1, 1], [], []>} : vector<8x8xf32>, vector<8x8xf32>, vector<8x8xf32> -> vector<8x8xf32>
    %96 = vector.extract_strided_slice %23 {offsets = [24, 0], sizes = [8, 32], strides = [1, 1]} : vector<32x32xf32> to vector<8x32xf32>
    %cst_46 = arith.constant dense<0.000000e+00> : vector<8x32xf32>
    %97 = tpu.matmul %95, %96, %cst_46 {dimension_numbers = #tpu.dot_dimension_numbers<[1], [0], [0], [1], [0, 0, 1, 1], [], []>} : vector<8x8xf32>, vector<8x32xf32>, vector<8x32xf32> -> vector<8x32xf32>
    %98 = arith.addf %80, %97 : vector<8x32xf32>
    %c0_47 = arith.constant 0 : index
    %c0_48 = arith.constant 0 : index
    %c0_49 = arith.constant 0 : index
    %99 = vector.load %arg12[%c0_47, %c0_48, %c0_49] : memref<1x8x32xf32, #tpu.memory_space<vmem>>, vector<1x8x32xf32>
    %100 = vector.shape_cast %99 : vector<1x8x32xf32> to vector<8x32xf32>
    %101 = vector.shape_cast %98 : vector<8x32xf32> to vector<1x8x32xf32>
    tpu.vector_store %arg12[%c0_47, %c0_48, %c0_49], %101 {strides = array<i32>} : memref<1x8x32xf32, #tpu.memory_space<vmem>>, vector<1x8x32xf32>,
    return
  }
  func.func @transform_0(%arg0: i32) -> (i32, i32, i32) {
    %c0_i32 = arith.constant 0 : i32
    %c0_i32_0 = arith.constant 0 : i32
    %c0_i32_1 = arith.constant 0 : i32
    return %arg0, %c0_i32, %c0_i32_0 : i32, i32, i32
  }
  func.func @transform_1(%arg0: i32) -> (i32, i32, i32) {
    %c0_i32 = arith.constant 0 : i32
    %c0_i32_0 = arith.constant 0 : i32
    %c0_i32_1 = arith.constant 0 : i32
    return %arg0, %c0_i32, %c0_i32_0 : i32, i32, i32
  }
  func.func @transform_2(%arg0: i32) -> (i32, i32, i32) {
    %c0_i32 = arith.constant 0 : i32
    %c0_i32_0 = arith.constant 0 : i32
    %c0_i32_1 = arith.constant 0 : i32
    return %arg0, %c0_i32, %c0_i32_0 : i32, i32, i32
  }
  func.func @transform_3(%arg0: i32) -> (i32, i32) {
    %c0_i32 = arith.constant 0 : i32
    %c0_i32_0 = arith.constant 0 : i32
    %c0_i32_1 = arith.constant 0 : i32
    return %c0_i32, %c0_i32_0 : i32, i32
  }
  func.func @transform_4(%arg0: i32) -> (i32, i32) {
    %c0_i32 = arith.constant 0 : i32
    %c0_i32_0 = arith.constant 0 : i32
    %c0_i32_1 = arith.constant 0 : i32
    return %c0_i32, %c0_i32_0 : i32, i32
  }
  func.func @transform_5(%arg0: i32) -> (i32, i32) {
    %c0_i32 = arith.constant 0 : i32
    %c0_i32_0 = arith.constant 0 : i32
    %c0_i32_1 = arith.constant 0 : i32
    return %c0_i32, %c0_i32_0 : i32, i32
  }
  func.func @transform_6(%arg0: i32) -> (i32, i32) {
    %c0_i32 = arith.constant 0 : i32
    %c0_i32_0 = arith.constant 0 : i32
    %c0_i32_1 = arith.constant 0 : i32
    return %c0_i32, %c0_i32_0 : i32, i32
  }
  func.func @transform_7(%arg0: i32) -> (i32, i32) {
    %c0_i32 = arith.constant 0 : i32
    %c0_i32_0 = arith.constant 0 : i32
    %c0_i32_1 = arith.constant 0 : i32
    return %c0_i32, %c0_i32_0 : i32, i32
  }
  func.func @transform_8(%arg0: i32) -> (i32, i32) {
    %c0_i32 = arith.constant 0 : i32
    %c0_i32_0 = arith.constant 0 : i32
    %c0_i32_1 = arith.constant 0 : i32
    return %c0_i32, %c0_i32_0 : i32, i32
  }
  func.func @transform_9(%arg0: i32) -> (i32, i32) {
    %c0_i32 = arith.constant 0 : i32
    %c0_i32_0 = arith.constant 0 : i32
    %c0_i32_1 = arith.constant 0 : i32
    return %c0_i32, %c0_i32_0 : i32, i32
  }
  func.func @transform_10(%arg0: i32) -> (i32, i32) {
    %c0_i32 = arith.constant 0 : i32
    %c0_i32_0 = arith.constant 0 : i32
    %c0_i32_1 = arith.constant 0 : i32
    return %c0_i32, %c0_i32_0 : i32, i32
  }
  func.func @transform_11(%arg0: i32) -> (i32, i32, i32) {
    %c0_i32 = arith.constant 0 : i32
    %c0_i32_0 = arith.constant 0 : i32
    %c0_i32_1 = arith.constant 0 : i32
    return %arg0, %c0_i32, %c0_i32_0 : i32, i32, i32
  }
}

</mosaic_0001>

<bundles_post_ra>
// kernel: tpu_custom_call.1
= control target key start
LH: loop header
LB: loop body
LE: loop exit
PB: predicated region body
PF: predicated region fallthrough
CT: control target
= control target key end

     0   :  { %s2965_s0 = inlined_call_operand.hbm [shape: f32[2,8,32], index: 0, kind: input, shape index: {}]   ;;  %s2966_s1 = inlined_call_operand.hbm [shape: f32[2,8,32], index: 1, kind: input, shape index: {}]   ;;  %s2967_s2 = inlined_call_operand.hbm [shape: f32[2,8,32], index: 2, kind: input, shape index: {}]   ;;  %s2968_s3 = inlined_call_operand.hbm [shape: f32[32,32], index: 3, kind: input, shape index: {}]   ;;  %s2969_s4 = inlined_call_operand.hbm [shape: f32[32,32], index: 4, kind: input, shape index: {}]   ;;  %s2970_s5 = inlined_call_operand.hbm [shape: f32[32,32], index: 5, kind: input, shape index: {}]   ;;  %s2971_s6 = inlined_call_operand.hbm [shape: f32[32,32], index: 6, kind: input, shape index: {}]   ;;  %s2972_s7 = inlined_call_operand.vmem [shape: f32[1,32], index: 7, kind: input, shape index: {}]   ;;  %s2973_s8 = inlined_call_operand.vmem [shape: f32[1,32], index: 8, kind: input, shape index: {}]   ;;  %s2974_s9 = inlined_call_operand.vmem [shape: f32[1,32], index: 9, kind: input, shape index: {}]   ;;  %s2975_s10 = inlined_call_operand.vmem [shape: f32[1,32], index: 10, kind: input, shape index: {}]   ;;  %s2976_s11 = inlined_call_operand.hbm [shape: f32[2,8,32], index: 11, kind: output, shape index: {}]  }
   0x1   :  { %2999 = sst [smem:[#allocation26_spill]] %s2965_s0 }
   0x2   :  { %3000 = sst [smem:[#allocation27_spill]] %s2966_s1 }
   0x3   :  { %3001 = sst [smem:[#allocation28_spill]] %s2968_s3 }
   0x4   :  { %3002 = sst [smem:[#allocation29_spill]] %s2970_s5 }
   0x5   :  { %3003 = sst [smem:[#allocation30_spill]] %s2976_s11 }
   0x6   :  { %16 = vsyncpa [#allocation3], 0 }
   0x7   :  { %18 = vsyncpa [#allocation3 + $0x1], 0 }
   0x8   :  { %19 = vsyncpa [#allocation6], 0 }
   0x9   :  { %21 = vsyncpa [#allocation6 + $0x1], 0 }
   0xa   :  { %22 = vsyncpa [#allocation9], 0 }
   0xb   :  { %23 = vsyncpa [#allocation12], 0 }
   0xc   :  { %24 = vsyncpa [#allocation4], 0 }
   0xd   :  { %26 = vsyncpa [#allocation4 + $0x1], 0  ;;  %s2560_s17 = smov 0   ;;  %s2562_s18 = smov 0  }
   0xe   :  { %s2564_s19 = smov 0   ;;  %s2566_s20 = smov 0  }
   0xf LB: > { %3004 = sst [smem:[#allocation20_spill]] %s2471_s17  ;;  %s2485_s21 = smov [#allocation8]   ;;  %s2483_s20 = sphi %s2566_s20, %s3042_s20   ;;  %s2479_s19 = sphi %s2564_s19, %s3046_s19   ;;  %s2475_s18 = sphi %s2562_s18, %s3045_s18   ;;  %s2471_s17 = sphi %s2560_s17, %s3044_s17  }
  0x10   : > { %3005 = sst [smem:[#allocation21_spill]] %s2483_s20  ;;  %s321_s22 = sshll.u32 %s2485_s21, 4  ;;  %s322_s22 = int_to_ptr.vmem [resolvable:$true] %s321_s22 }
  0x11   : > { %s2581_s23 = sadd.s32 4294967295, %s2483_s20   ;;  %p1919_p0 = scmp.ge.s32.totalorder %s2483_s20, 1 }
  0x12   : > { %p2991_p1 = scmp.eq.s32.totalorder %s2581_s23, 0  ;;  %p309_p2 = scmp.lt.s32.totalorder %s2483_s20, 3 }
  0x13   : > { %s2486_s25 = smov [#allocation11]   ;;  %s2230_s28 = scalar_lea.vmem %s322_s22, 512 }
  0x14   : > { %p2586_p3 = pnand %p1919_p0, %p309_p2  ;;  %s347_s26 = sshll.u32 %s2486_s25, 4  ;;  %s348_s26 = int_to_ptr.vmem [resolvable:$true] %s347_s26 }
  0x15   : > { %p2231_p8 = scmp.ne.s32.totalorder %s322_s22, %s2230_s28  ;;  %p2238_p11 = scmp.lt.s32.totalorder %s322_s22, %s322_s22 }
  0x16   : > { %s3006_s24 = scalar_select %p2586_p3, 1, 0 }
  0x17   : > { %p2123_p5 = pneg %p2586_p3  ;;  %p2239_p12 = scmp.lt.s32.totalorder %s2230_s28, %s2230_s28 }
  0x19   : > { %p2595_p6 = pnand %p2123_p5, %p2991_p1  ;;  %p2240_p13 = por %p2239_p12, %p2238_p11 }
  0x1b   : > { %s3007_s27 = scalar_select %p2595_p6, 1, 0 }
  0x1c   : > { %p2977_p7 = pneg %p2595_p6 }
  0x1e   : > { %p2233_p9 = pnand %p2231_p8, %p2977_p7 }
  0x20   : > { %p2234_p10 = pneg %p2233_p9 }
  0x22   : > { %p2241_p0 = pnand %p2240_p13, %p2234_p10 }
  0x24   : > { %2244 = shalt.err (!%p2241_p0)
}
  0x25   : > { %s2978_s29 = smov 128   ;;  %s2980_s30 = smov 8  }
  0x26   : > { %s3008_s3 = sld [smem:[#allocation28_spill]]  ;;  %s2256_s14 = scalar_lea.vmem %s348_s26, 512 }
  0x27   : > { %p2257_p2 = scmp.ne.s32.totalorder %s348_s26, %s2256_s14  ;;  %p2264_p9 = scmp.lt.s32.totalorder %s348_s26, %s348_s26 }
  0x28   : > { %p2265_p10 = scmp.lt.s32.totalorder %s2256_s14, %s2256_s14 }
  0x29   : > { %p2259_p5 = pnand %p2257_p2, %p2977_p7 }
  0x2a   : > { %p2266_p11 = por %p2265_p10, %p2264_p9 }
  0x2b   : > { %p2260_p8 = pneg %p2259_p5 }
  0x2c   : > { %2126 = dma.hbm_to_vmem [thread:$0]  (!%p2595_p6), %s3008_s3, 512, %s322_s22, [#allocation9], %s2978_s29, %s2978_s29, %s2980_s30  }
  0x2d   : > { %p2267_p12 = pnand %p2266_p11, %p2260_p8 }
  0x2f   : > { %2270 = shalt.err (!%p2267_p12)
}
  0x30   : > { %s3009_s5 = sld [smem:[#allocation29_spill]]  ;;  %s1918_s21 = sadd.s32 4294967294, %s2483_s20  }
  0x31   : > { %s2625_s22 = sadd.s32 1, %s2483_s20   ;;  %s39_s28 = sadd.s32 1, %s2479_s19 }
  0x32   : > { %3010 = sst [smem:[#allocation22_spill]] %s2625_s22  ;;  %s36_s25 = ssub.s32 %s2483_s20, %s2625_s22 }
  0x33   : > { %p37_p13 = scmp.eq.s32.totalorder %s36_s25, 0  ;;  %p46_p0 = scmp.ne.s32.totalorder %s2479_s19, %s2475_s18 }
  0x34   : > { %p47_p2 = scmp.eq.s32.totalorder %s2483_s20, 0  ;;  %p52_p5 = scmp.ne.s32.totalorder %s2475_s18, %s2471_s17 }
  0x35   : > { %s2636_s12 = scalar_select %p37_p13, %s2479_s19, %s39_s28  }
  0x36   : > { %2132 = dma.hbm_to_vmem [thread:$0]  (!%p2595_p6), %s3009_s5, 512, %s348_s26, [#allocation12], %s2978_s29, %s2978_s29, %s2980_s30  }
  0x37   : > { %3011 = sst [smem:[#allocation23_spill]] %s2636_s12  ;;  %p48_p8 = por %p47_p2, %p46_p0 }
  0x38   : > { %p2640_p9 = por %p2991_p1, %p52_p5  ;;  %p296_p10 = scmp.eq.s32.totalorder %s2581_s23, 1 }
  0x39   : > { %p302_p11 = scmp.eq.s32.totalorder %s1918_s21, 1  ;;  %p2154_p12 = scmp.lt.s32.totalorder %s2483_s20, 2 }
  0x3a   : > { %s3012_s13 = scalar_select %p2640_p9, 1, 0 }
  0x3b   : > { %s2982_s26 = sand.u32 1, %s2479_s19   ;;  %p2647_p4 = por %p296_p10, %p46_p0 }
  0x3c   : > { %p2651_p7 = por %p302_p11, %p52_p5  ;;  %s2657_s16 = sshll.u32 %s2982_s26, 3 }
  0x3d   : > { %s3013_s14 = scalar_select %p2647_p4, 1, 0 }
  0x3e   : > { %s3015_s15 = scalar_select %p2651_p7, 1, 0 }
  0x3f   : > { %3014 = sst [smem:[#allocation24_spill]] %s3013_s14  ;;  %s2660_s25 = sshll.u32 %s2483_s20, 7 }
  0x40   : > { %3016 = sst [smem:[#allocation25_spill]] %s3015_s15  ;;  %p2662_p13 = pnand %p2154_p12, %p48_p8 }
  0x41   : > { %s404_s21 = sand.u32 1, %s2483_s20   ;;  %s3018_s1 = sld [smem:[#allocation27_spill]] }
  0x42   : > { %s408_s26 = scalar_lea.vmem [#allocation5], %s2657_s16  ;;  %s2489_s12 = smov [#allocation10]  }
  0x43   : > { %s415_s5 = sshll.u32 %s408_s26, 4  ;;  %s334_s22 = sshll.u32 %s2489_s12, 4  ;;  %s2674_s5 = int_to_ptr.vmem [resolvable:$true] %s415_s5  ;;  %s335_s22 = int_to_ptr.vmem [resolvable:$true] %s334_s22 }
  0x44   : > { %s2676_s15 = scalar_lea.sflag [#allocation6], %s404_s21  ;;  %p2682_p2 = pneg %p2662_p13 }
  0x46   : > { %s3019_s20 = scalar_select %p2682_p2, 1, 0 }
  0x47   : > { %s2671_s3 = scalar_lea.hbm %s3018_s1, %s2660_s25  ;;  %s2276_s26 = scalar_lea.hbm %s3018_s1, 256 }
  0x48   : > { %s2271_s17 = scalar_lea.hbm %s2671_s3, 128  ;;  %p2277_p10 = scmp.lt.s32.totalorder %s2671_s3, %s3018_s1 }
  0x49   : > { %p2272_p0 = scmp.ne.s32.totalorder %s2671_s3, %s2271_s17  ;;  %p2278_p11 = scmp.lt.s32.totalorder %s2276_s26, %s2271_s17 }
  0x4b   : > { %p2274_p5 = pnand %p2682_p2, %p2272_p0  ;;  %p2279_p12 = por %p2278_p11, %p2277_p10 }
  0x4d   : > { %p2275_p8 = pneg %p2274_p5 }
  0x4f   : > { %p2280_p1 = pnand %p2279_p12, %p2275_p8 }
  0x51   : > { %2283 = shalt.err (!%p2280_p1)
}
  0x52   : > { %s2284_s12 = scalar_lea.vmem %s2674_s5, 128  ;;  %s2490_s21 = smov [#allocation5]  }
  0x53   : > { %p2285_p7 = scmp.ne.s32.totalorder %s2674_s5, %s2284_s12  ;;  %s2289_s29 = sshll.u32 %s2490_s21, 4  ;;  %s2290_s29 = int_to_ptr.vmem [resolvable:$false] %s2289_s29 }
  0x54   : > { %s2291_s30 = scalar_lea.vmem %s2290_s29, 256  ;;  %p2292_p4 = scmp.lt.s32.totalorder %s2674_s5, %s2290_s29 }
  0x55   : > { %p2287_p0 = pnand %p2285_p7, %p2682_p2  ;;  %p2293_p9 = scmp.lt.s32.totalorder %s2291_s30, %s2284_s12 }
  0x57   : > { %p2288_p5 = pneg %p2287_p0  ;;  %p2294_p3 = por %p2293_p9, %p2292_p4 }
  0x59   : > { %p2295_p6 = pnand %p2294_p3, %p2288_p5 }
  0x5b   : > { %2298 = shalt.err (!%p2295_p6)
}
  0x5c   : > { %2142 = dma.hbm_to_vmem [thread:$0]  (!%p2662_p13), %s2671_s3, 128, %s2674_s5, %s2676_s15  }
  0x5d   : > { %s2310_s11 = scalar_lea.vmem %s335_s22, 512  ;;  %p3020_p7 = scmp.ne.s32.totalorder %s3007_s27, 0 }
  0x5e   : > { %p2311_p1 = scmp.ne.s32.totalorder %s335_s22, %s2310_s11  ;;  %p2318_p12 = scmp.lt.s32.totalorder %s335_s22, %s335_s22 }
  0x5f   : > { %p3021_p8 = pneg %p3020_p7  ;;  %p2319_p0 = scmp.lt.s32.totalorder %s2310_s11, %s2310_s11 }
  0x61   : > { %p2313_p10 = pnand %p2311_p1, %p3021_p8  ;;  %p2320_p2 = por %p2319_p0, %p2318_p12 }
  0x63   : > { %p2314_p11 = pneg %p2313_p10 }
  0x65   : > { %p2321_p4 = pnand %p2320_p2, %p2314_p11 }
  0x67   : > { %2324 = shalt.err (!%p2321_p4)
}
  0x68   : > { %s3022_s17 = smov 8   ;;  %s3023_s14 = smov 128  }
  0x69   : > { %2129 = dma.hbm_to_vmem [thread:$0]  (!%p3020_p7), %s2969_s4, 512, %s335_s22, [#allocation9], %s3023_s14, %s3023_s14, %s3022_s17  }
  0x6a   : > { %s2491_s3 = smov [#allocation13]   ;;  %p3024_p6 = pmov %p3021_p8 }
  0x6b   : > { %s360_s5 = sshll.u32 %s2491_s3, 4  ;;  %s361_s5 = int_to_ptr.vmem [resolvable:$true] %s360_s5 }
  0x6c   : > { %s2336_s21 = scalar_lea.vmem %s361_s5, 512  ;;  %p2344_p5 = scmp.lt.s32.totalorder %s361_s5, %s361_s5 }
  0x6d   : > { %p2337_p3 = scmp.ne.s32.totalorder %s361_s5, %s2336_s21  ;;  %p2345_p1 = scmp.lt.s32.totalorder %s2336_s21, %s2336_s21 }
  0x6f   : > { %p2339_p9 = pnand %p2337_p3, %p3024_p6  ;;  %p2346_p8 = por %p2345_p1, %p2344_p5 }
  0x71   : > { %p2340_p2 = pneg %p2339_p9 }
  0x73   : > { %p2347_p10 = pnand %p2346_p8, %p2340_p2 }
  0x75   : > { %2350 = shalt.err (!%p2347_p10)
}
  0x76   : > { %2135 = dma.hbm_to_vmem [thread:$0]  (!%p3020_p7), %s2971_s6, 512, %s361_s5, [#allocation12], %s3023_s14, %s3023_s14, %s3022_s17  }
  0x77   : > { %s3025_s0 = sld [smem:[#allocation26_spill]]  ;;  %s390_s27 = scalar_lea.vmem [#allocation2], %s2657_s16 }
  0x78   : > { %s397_s12 = sshll.u32 %s390_s27, 4  ;;  %s3026_s3 = sand.u32 1, %s2479_s19   ;;  %s398_s12 = int_to_ptr.vmem [resolvable:$true] %s397_s12 }
  0x79   : > { %s387_s21 = scalar_lea.sflag [#allocation3], %s3026_s3  ;;  %p3027_p12 = scmp.ne.s32.totalorder %s3019_s20, 0 }
  0x7d   : > { %s2731_s26 = scalar_lea.hbm %s3025_s0, %s2660_s25  ;;  %s2356_s14 = scalar_lea.hbm %s3025_s0, 256 }
  0x7e   : > { %s2351_s1 = scalar_lea.hbm %s2731_s26, 128  ;;  %p2357_p7 = scmp.lt.s32.totalorder %s2731_s26, %s3025_s0 }
  0x7f   : > { %p2352_p11 = scmp.ne.s32.totalorder %s2731_s26, %s2351_s1  ;;  %p2358_p3 = scmp.lt.s32.totalorder %s2356_s14, %s2351_s1 }
  0x81   : > { %p2354_p0 = pnand %p2352_p11, %p3027_p12  ;;  %p2359_p6 = por %p2358_p3, %p2357_p7 }
  0x83   : > { %p2355_p4 = pneg %p2354_p0 }
  0x85   : > { %p2360_p9 = pnand %p2359_p6, %p2355_p4 }
  0x87   : > { %2363 = shalt.err (!%p2360_p9)
}
  0x88   : > { %s2364_s30 = scalar_lea.vmem %s398_s12, 128  ;;  %s2492_s11 = smov [#allocation2]  }
  0x89   : > { %p2365_p2 = scmp.ne.s32.totalorder %s398_s12, %s2364_s30  ;;  %s2369_s27 = sshll.u32 %s2492_s11, 4  ;;  %s2370_s27 = int_to_ptr.vmem [resolvable:$false] %s2369_s27 }
  0x8a   : > { %s2371_s3 = scalar_lea.vmem %s2370_s27, 256  ;;  %p2372_p8 = scmp.lt.s32.totalorder %s398_s12, %s2370_s27 }
  0x8b   : > { %p2367_p5 = pnand %p2365_p2, %p3027_p12  ;;  %p2373_p10 = scmp.lt.s32.totalorder %s2371_s3, %s2364_s30 }
  0x8d   : > { %p2368_p1 = pneg %p2367_p5  ;;  %p2374_p11 = por %p2373_p10, %p2372_p8 }
  0x8f   : > { %p2375_p0 = pnand %p2374_p11, %p2368_p1 }
  0x91   : > { %2378 = shalt.err (!%p2375_p0)
}
  0x92   : > { %2139 = dma.hbm_to_vmem [thread:$0]  (!%p2662_p13), %s2731_s26, 128, %s398_s12, %s387_s21  }
  0x93   : > { %s431_s17 = scalar_lea.hbm %s2967_s2, %s2660_s25  ;;  %s426_s14 = scalar_lea.vmem [#allocation7], %s2657_s16 }
  0x94   : > { %s433_s5 = sshll.u32 %s426_s14, 4  ;;  %s2379_s29 = scalar_lea.hbm %s431_s17, 128  ;;  %s434_s5 = int_to_ptr.vmem [resolvable:$true] %s433_s5 }
  0x95   : > { %p2380_p4 = scmp.ne.s32.totalorder %s431_s17, %s2379_s29  ;;  %s2384_s27 = scalar_lea.hbm %s2967_s2, 256 }
  0x96   : > { %p2385_p6 = scmp.lt.s32.totalorder %s431_s17, %s2967_s2  ;;  %p2386_p9 = scmp.lt.s32.totalorder %s2384_s27, %s2379_s29 }
  0x97   : > { %p2382_p7 = pnand %p2380_p4, %p3027_p12 }
  0x98   : > { %p2387_p2 = por %p2386_p9, %p2385_p6 }
  0x99   : > { %p2383_p3 = pneg %p2382_p7 }
  0x9b   : > { %p2388_p5 = pnand %p2387_p2, %p2383_p3 }
  0x9d   : > { %2391 = shalt.err (!%p2388_p5)
}
  0x9e   : > { %s2392_s16 = scalar_lea.vmem %s434_s5, 128  ;;  %s2493_s25 = smov [#allocation7]  }
  0x9f   : > { %p2393_p1 = scmp.ne.s32.totalorder %s434_s5, %s2392_s16  ;;  %s2397_s26 = sshll.u32 %s2493_s25, 4  ;;  %s2398_s26 = int_to_ptr.vmem [resolvable:$false] %s2397_s26 }
  0xa0   : > { %s2399_s12 = scalar_lea.vmem %s2398_s26, 256  ;;  %p2400_p11 = scmp.lt.s32.totalorder %s434_s5, %s2398_s26 }
  0xa1   : > { %p2395_p8 = pnand %p2393_p1, %p3027_p12  ;;  %p2401_p0 = scmp.lt.s32.totalorder %s2399_s12, %s2392_s16 }
  0xa3   : > { %p2396_p10 = pneg %p2395_p8  ;;  %p2402_p4 = por %p2401_p0, %p2400_p11 }
  0xa5   : > { %p2403_p7 = pnand %p2402_p4, %p2396_p10 }
  0xa7   : > { %2406 = shalt.err (!%p2403_p7)
}
  0xa8   : > { %2145 = dma.hbm_to_vmem [thread:$0]  (!%p2662_p13), %s431_s17, 128, %s434_s5, %s2676_s15  }
  0xa9   : > { %p3028_p3 = scmp.ne.s32.totalorder %s3006_s24, 0 }
  0xaa   : > { %s2773_s0 = sand.u32 (!%p3028_p3), 1, %s2475_s18   ;;  %p3029_p12 = scmp.ne.s32.totalorder (!%p3028_p3), %s3012_s13, 0 }
  0xab   : > { %442 = sbr.rel (%p3028_p3) target bundleno = 2828 (0xb0c), region = 64  ;;  %s2776_s20 = sshll.u32 (!%p3028_p3), %s2773_s0, 3 }
  0xac   : > { %s445_s21 = scalar_lea.sflag (!%p3028_p3), [#allocation3], %s2773_s0  ;;  %s448_s1 = scalar_lea.vmem (!%p3028_p3), [#allocation2], %s2776_s20 }
  0xb0   : > { %2450 = dma.done.wait (%p3029_p12), %s445_s21, 128  }
  0xb1   : > { %2452 = vsyncadd (%p3029_p12), %s445_s21, 4294967168  ;;  %s453_s24 = sand.u32 1, %s2581_s23   ;;  %s457_s28 = scalar_lea.vmem [#allocation5], %s2776_s20 }
  0xb2   : > { %s454_s15 = scalar_lea.sflag [#allocation6], %s453_s24 }
  0xb3   : > { %2454 = dma.done.wait (%p3029_p12), %s454_s15, 256  }
  0xb4   : > { %2456 = vsyncadd (%p3029_p12), %s454_s15, 4294967040  ;;  %s466_s22 = scalar_lea.vmem [#allocation7], %s2776_s20  ;;  %p3030_p13 = scmp.eq.s32.totalorder %s2581_s23, 0 }
  0xb6   : > { %2458 = dma.done.wait (%p3030_p13), [#allocation9], 1024   ;;  %p3031_p6 = pmov %p3030_p13 }
  0xb8   : > { %2460 = vsyncadd (%p3031_p6), [#allocation9], 4294966272  ;;  %p3032_p9 = pmov %p3031_p6 }
  0xb9   : > { %p3033_p2 = pmov %p3031_p6 }
  0xba   : > { %2462 = dma.done.wait (%p3032_p9), [#allocation12], 1024  }
  0xbb   : > { %2464 = vsyncadd (%p3033_p2), [#allocation12], 4294966272  ;;  %v2494_v0 = vmov 0.0   ;;  %vm2495_vm0 = vmmov 0   ;;  %v537_v1 = vld [vmem:[#allocation8 + $0x18] sm:$0xff]  ;;  %v536_v3 = vld [vmem:[#allocation8 + $0x10] sm:$0xff] }
  0xbc   : > { %2006 = vmatprep.subr.mxu0 %v2494_v0  ;;  %2017 = vmatprep.subr.mxu1 %v2494_v0  ;;  %v623_v2 = vld [vmem:[#allocation10 + $0x18] sm:$0xff]  ;;  %v622_v4 = vld [vmem:[#allocation10 + $0x10] sm:$0xff]  ;;  %v535_v5 = vld [vmem:[#allocation8 + $0x8] sm:$0xff]  ;;  %vm545_vm1 = vcmask 261120   ;;  %vm799_vm2 = vcmask 64512   ;;  %s2496_s29 = smov 120  }
  0xbd   : > { %2014 = vmatprep.mubr.msk.f32.mxu0 %vm2495_vm0, %v2494_v0  ;;  %2025 = vmatprep.mubr.msk.f32.mxu1 %vm2495_vm0, %v2494_v0  ;;  %v621_v6 = vld [vmem:[#allocation10 + $0x8] sm:$0xff]  ;;  %v534_v7 = vld [vmem:[#allocation8] sm:$0xff]  ;;  %v531_v9 = vld [vmem:[%s448_s1] sm:$0xff]  ;;  %s2497_s27 = smov 112   ;;  %s2498_s3 = smov 104  }
  0xbe   : > { %2007 = vmatpush3.msra.mxu0 %v537_v1  ;;  %2018 = vmatpush3.msra.mxu1 %v623_v2  ;;  %v620_v8 = vld [vmem:[#allocation10] sm:$0xff]  ;;  %v1940_v11 = vld [vmem:[%s2972_s7] ss:$0 sm:$0xff]  ;;  %v707_v20 = vld [vmem:[#allocation11 + $0x18] sm:$0xff]  ;;  %s3034_s26 = sld [smem:[#allocation24_spill]]  ;;  %s1964_s12 = sshll.u32 %s2581_s23, 7 }
  0xbf   : > { %2008 = vmatprep.subr.mxu0 %v2494_v0  ;;  %2019 = vmatprep.subr.mxu1 %v2494_v0  ;;  %v532_v10 = vld [vmem:[%s457_s28] sm:$0xff]  ;;  %v1942_v12 = vld [vmem:[%s2973_s8] ss:$0 sm:$0xff]  ;;  %s530_s21 = scalar_lea.vmem [#allocation14], %s2776_s20  ;;  %s3035_s28 = sld [smem:[#allocation30_spill]] }
  0xc0   : > { %2009 = vmatpush3.msra.mxu0 %v536_v3  ;;  %2020 = vmatpush3.msra.mxu1 %v622_v4  ;;  %v706_v21 = vld [vmem:[#allocation11 + $0x10] sm:$0xff]  ;;  %v705_v22 = vld [vmem:[#allocation11 + $0x8] sm:$0xff]  ;;  %v704_v23 = vld [vmem:[#allocation11] sm:$0xff]  ;;  %s1767_s1 = sshll.u32 %s530_s21, 4  ;;  %s1754_s13 = scalar_lea.sflag [#allocation4], %s2773_s0  ;;  %s1768_s1 = int_to_ptr.vmem [resolvable:$true] %s1767_s1 }
  0xc1   : > { %2010 = vmatprep.subr.mxu0 %v2494_v0  ;;  %2021 = vmatprep.subr.mxu1 %v2494_v0  ;;  %v533_v24 = vld [vmem:[%s466_s22] sm:$0xff]  ;;  %v788_v42 = vld [vmem:[#allocation13] sm:$0xff]  ;;  %v789_v55 = vld [vmem:[#allocation13 + $0x8] sm:$0xff]  ;;  %s2407_s17 = scalar_lea.vmem %s1768_s1, 128  ;;  %s2499_s23 = smov [#allocation14]  }
  0xc2   : > { %2011 = vmatpush3.msra.mxu0 %v535_v5  ;;  %2022 = vmatpush3.msra.mxu1 %v621_v6  ;;  %v1944_v33 = vld [vmem:[%s2974_s9] ss:$0 sm:$0xff]  ;;  %p2408_p5 = scmp.ne.s32.totalorder %s1768_s1, %s2407_s17  ;;  %s2411_s20 = sshll.u32 %s2499_s23, 4  ;;  %s2412_s20 = int_to_ptr.vmem [resolvable:$false] %s2411_s20 }
  0xc3   : > { %2012 = vmatprep.subr.mxu0 %v2494_v0  ;;  %2023 = vmatprep.subr.mxu1 %v2494_v0  ;;  %s2413_s14 = scalar_lea.vmem %s2412_s20, 256  ;;  %p2414_p11 = scmp.lt.s32.totalorder %s1768_s1, %s2412_s20 }
  0xc4   : > { %2013 = vmatpush3.msra.mxu0 %v534_v7  ;;  %2024 = vmatpush3.msra.mxu1 %v620_v8  ;;  %p3036_p1 = scmp.ne.s32.totalorder %s3034_s26, 0  ;;  %p2415_p0 = scmp.lt.s32.totalorder %s2413_s14, %s2407_s17 }
  0xc5   : > { %2015 = vmatmul.mubr.msk.f32.vlgmr.msra.gmra.mxu0 %vm545_vm1, %v531_v9  ;;  %2026 = vmatmul.mubr.msk.f32.vlgmr.msra.gmra.mxu1 %vm545_vm1, %v532_v10  ;;  %v1946_v10 = vld [vmem:[%s2975_s10] ss:$0 sm:$0xff]  ;;  %s2927_s22 = scalar_lea.hbm %s3035_s28, %s1964_s12 }
  0xc6   : > { %2039 = vmatprep.subr.mxu1 %v2494_v0  ;;  %2041 = vmatprep.mubr.msk.f32.mxu1 %vm2495_vm0, %v2494_v0  ;;  %p2409_p8 = pnand %p2408_p5, %p3036_p1  ;;  %p2416_p4 = por %p2415_p0, %p2414_p11 }
  0xc7   : > { %2028 = vmatprep.subr.mxu0 %v2494_v0  ;;  %2036 = vmatprep.mubr.msk.f32.mxu0 %vm2495_vm0, %v2494_v0 }
  0xc8   : > { %2029 = vmatpush3.msra.mxu0 %v707_v20  ;;  %v790_v20 = vld [vmem:[#allocation13 + $0x10] sm:$0xff]  ;;  %p2410_p10 = pneg %p2409_p8 }
  0xc9   : > { %2030 = vmatprep.subr.mxu0 %v2494_v0 }
  0xca   : > { %2031 = vmatpush3.msra.mxu0 %v706_v21  ;;  %p2417_p7 = pnand %p2416_p4, %p2410_p10 }
  0xcb   : > { %2032 = vmatprep.subr.mxu0 %v2494_v0 }
  0xcc   : > { %2033 = vmatpush3.msra.mxu0 %v705_v22 }
  0xcd   : > { %2034 = vmatprep.subr.mxu0 %v2494_v0 }
  0xce   : > { %2035 = vmatpush3.msra.mxu0 %v704_v23 }
  0xcf   : > { %2037 = vmatmul.mubr.msk.f32.vlgmr.msra.gmra.mxu0 %vm545_vm1, %v533_v24  ;;  %2049 = vmatprep.subr.mxu0 %v2494_v0 }
  0xd0   : > { %2051 = vmatprep.mubr.msk.f32.mxu0 %vm2495_vm0, %v2494_v0  ;;  %2050 = vmatpush3.msra.mxu0 %v788_v42 }
  0xd1   : > { %2059 = vmatprep.subr.mxu0 %v2494_v0 }
 0x185   : > { %v615_v13 = vpop.f32.mrf.mxu0  ;;  %v700_v14 = vpop.f32.mrf.mxu1 }
 0x186   : > { %v616_v15 = vadd.f32 %v1940_v11, %v615_v13  ;;  %v2829_v16 = vadd.f32 %v1942_v12, %v700_v14 }
 0x187   : > { %v2016_v17 = vpop.f32.mrf.mxu0  ;;  %v2027_v18 = vpop.f32.mrf.mxu1 }
 0x188   : > { %v2831_v19 = vmul.f32 0.35355338, %v616_v15  ;;  %1036 = vrot.lane.b32.xlu1 %v2829_v16, %s2496_s29  ;;  %2040 = vmatpush3.xpose.msk.msra.mxu1 %vm799_vm2, %v2829_v16 }
 0x189   : > { %2044 = vmatprep.subr.mxu1 %v2494_v0 }
 0x18b   : > { %2042 = vmatmul.mubr.msk.f32.vlgmr.msra.gmra.mxu1 %vm799_vm2, %v2831_v19 }
 0x18c   : > { %1034 = vrot.lane.b32.xlu1 %v2831_v19, %s2496_s29  ;;  %2046 = vmatprep.mubr.msk.f32.mxu1 %vm2495_vm0, %v2494_v0 }
 0x18f   : > { %v784_v34 = vpop.f32.mrf.mxu0 }
 0x190   : > { %v2858_v35 = vadd.f32 %v1944_v33, %v784_v34 }
 0x191   : > { %v2038_v36 = vpop.f32.mrf.mxu0 }
 0x192   : > { %2045 = vmatpush3.msra.mxu1 %v2858_v35 }
 0x193   : > { %2054 = vmatprep.subr.mxu1 %v2494_v0 }
 0x1fa   : > { %v1037_v39 = vpop.permute.xlu1 %1036 }
 0x1fe   : > { %v1035_v41 = vpop.permute.xlu1 %1034 }
 0x24b   : > { %v872_v25 = vpop.f32.mrf.mxu1 }
 0x24c   : > { %v876_v26 = vsel %vm799_vm2, %v872_v25, -inf }
 0x24d   : > { %877 = vmax.xlane.f32.xlu0 %v876_v26  ;;  %v2043_v27 = vpop.f32.mrf.mxu1 }
 0x2d6   : > { %v878_v28 = vpop.xlane.xlu0 %877 }
 0x2d7   : > { %v879_v29 = vsub.f32 %v872_v25, %v878_v28 }
 0x2d9   : > { %v880_v30 = vmul.f32 1.442695, %v879_v29 }
 0x2db   : > { %2203 = vpow2.f32 %v880_v30 }
 0x2e8   : > { %v2204_v31 = vpop.eup %2203 }
 0x2e9   : > { %v882_v32 = vsel %vm799_vm2, %v2204_v31, 0.0 }
 0x2ea   : > { %883 = vadd.xlane.f32.xlu0 %v882_v32 }
 0x373   : > { %v884_v37 = vpop.xlane.xlu0 %883 }
 0x374   : > { %2205 = vrcp.f32 %v884_v37 }
 0x381   : > { %v2206_v38 = vpop.eup %2205 }
 0x382   : > { %v886_v40 = vmul.f32 %v2206_v38, %v2204_v31 }
 0x384   : > { %2047 = vmatmul.mubr.msk.f32.vlgmr.msra.gmra.mxu1 %vm799_vm2, %v886_v40 }
 0x385   : > { %2055 = vmatpush3.xpose.msk.msra.mxu1 %vm799_vm2, %v1037_v39  ;;  %2056 = vmatprep.mubr.msk.f32.mxu1 %vm2495_vm0, %v2494_v0 }
 0x386   : > { %2064 = vmatprep.subr.mxu1 %v2494_v0 }
 0x388   : > { %2057 = vmatmul.mubr.msk.f32.vlgmr.msra.gmra.mxu1 %vm799_vm2, %v1035_v41 }
 0x389   : > { %2066 = vmatprep.mubr.msk.f32.mxu1 %vm2495_vm0, %v2494_v0  ;;  %2065 = vmatpush3.msra.mxu1 %v789_v55 }
 0x38a   : > { %2074 = vmatprep.subr.mxu1 %v2494_v0 }
 0x444   : > { %v956_v43 = vpop.f32.mrf.mxu1 }
 0x445   : > { %2052 = vmatmul.mubr.msk.f32.vlgmr.msra.gmra.mxu0 %vm799_vm2, %v956_v43 }
 0x446   : > { %v2048_v44 = vpop.f32.mrf.mxu1  ;;  %2061 = vmatprep.mubr.msk.f32.mxu0 %vm2495_vm0, %v2494_v0 }
 0x448   : > { %v1108_v45 = vpop.f32.mrf.mxu1 }
 0x449   : > { %v1112_v46 = vsel %vm799_vm2, %v1108_v45, -inf }
 0x44a   : > { %1113 = vmax.xlane.f32.xlu0 %v1112_v46  ;;  %v2058_v47 = vpop.f32.mrf.mxu1 }
 0x460   : > { %1124 = vrot.lane.b32.xlu0 %v2858_v35, %s2496_s29 }
 0x464   : > { %1276 = vrot.lane.b32.xlu0 %v2829_v16, %s2497_s27 }
 0x468   : > { %1274 = vrot.lane.b32.xlu0 %v2831_v19, %s2497_s27 }
 0x4d3   : > { %v1114_v48 = vpop.xlane.xlu0 %1113 }
 0x4d4   : > { %v1115_v49 = vsub.f32 %v1108_v45, %v1114_v48 }
 0x4d6   : > { %v1116_v50 = vmul.f32 1.442695, %v1115_v49 }
 0x4d7   : > { %v1125_v51 = vpop.permute.xlu0 %1124 }
 0x4d8   : > { %2207 = vpow2.f32 %v1116_v50  ;;  %2060 = vmatpush3.msra.mxu0 %v1125_v51 }
 0x4d9   : > { %2069 = vmatprep.subr.mxu0 %v2494_v0 }
 0x4db   : > { %v1277_v59 = vpop.permute.xlu0 %1276 }
 0x4df   : > { %v1275_v61 = vpop.permute.xlu0 %1274 }
 0x4e5   : > { %v2208_v52 = vpop.eup %2207 }
 0x4e6   : > { %v1118_v53 = vsel %vm799_vm2, %v2208_v52, 0.0 }
 0x4e7   : > { %1119 = vadd.xlane.f32.xlu1 %v1118_v53 }
 0x4f8   : > { %1363 = vrot.lane.b32.xlu1 %v2858_v35, %s2497_s27 }
 0x4fc   : > { %1515 = vrot.lane.b32.xlu1 %v2829_v16, %s2498_s3 }
 0x505   : > { %v1029_v54 = vpop.f32.mrf.mxu0 }
 0x506   : > { %v1033_v11 = vadd.f32 %v1946_v10, %v1029_v54 }
 0x507   : > { %v2053_v56 = vpop.f32.mrf.mxu0 }
 0x570   : > { %v1120_v57 = vpop.xlane.xlu1 %1119 }
 0x571   : > { %2209 = vrcp.f32 %v1120_v57 }
 0x574   : > { %v1364_v63 = vpop.permute.xlu1 %1363 }
 0x578   : > { %v1516_v15 = vpop.permute.xlu1 %1515 }
 0x57e   : > { %v2210_v58 = vpop.eup %2209 }
 0x57f   : > { %v1122_v60 = vmul.f32 %v2210_v58, %v2208_v52 }
 0x581   : > { %2062 = vmatmul.mubr.msk.f32.vlgmr.msra.gmra.mxu0 %vm799_vm2, %v1122_v60 }
 0x582   : > { %2070 = vmatpush3.xpose.msk.msra.mxu0 %vm799_vm2, %v1277_v59  ;;  %2071 = vmatprep.mubr.msk.f32.mxu0 %vm2495_vm0, %v2494_v0 }
 0x583   : > { %2079 = vmatprep.subr.mxu0 %v2494_v0 }
 0x585   : > { %2072 = vmatmul.mubr.msk.f32.vlgmr.msra.gmra.mxu0 %vm799_vm2, %v1275_v61 }
 0x586   : > { %2081 = vmatprep.mubr.msk.f32.mxu0 %vm2495_vm0, %v2494_v0  ;;  %2080 = vmatpush3.msra.mxu0 %v790_v20 }
 0x587   : > { %2089 = vmatprep.subr.mxu0 %v2494_v0 }
 0x641   : > { %v1196_v62 = vpop.f32.mrf.mxu0 }
 0x642   : > { %2067 = vmatmul.mubr.msk.f32.vlgmr.msra.gmra.mxu1 %vm799_vm2, %v1196_v62 }
 0x643   : > { %2075 = vmatpush3.msra.mxu1 %v1364_v63  ;;  %v2063_v1 = vpop.f32.mrf.mxu0  ;;  %2076 = vmatprep.mubr.msk.f32.mxu1 %vm2495_vm0, %v2494_v0 }
 0x644   : > { %2084 = vmatprep.subr.mxu1 %v2494_v0 }
 0x645   : > { %v1348_v2 = vpop.f32.mrf.mxu0 }
 0x646   : > { %v1352_v3 = vsel %vm799_vm2, %v1348_v2, -inf }
 0x647   : > { %1353 = vmax.xlane.f32.xlu0 %v1352_v3  ;;  %v2073_v4 = vpop.f32.mrf.mxu0 }
 0x6d0   : > { %v1354_v5 = vpop.xlane.xlu0 %1353 }
 0x6d1   : > { %v1355_v6 = vsub.f32 %v1348_v2, %v1354_v5 }
 0x6d3   : > { %v1356_v7 = vmul.f32 1.442695, %v1355_v6 }
 0x6d5   : > { %2211 = vpow2.f32 %v1356_v7 }
 0x6e2   : > { %v2212_v8 = vpop.eup %2211 }
 0x6e3   : > { %v1358_v9 = vsel %vm799_vm2, %v2212_v8, 0.0 }
 0x6e4   : > { %1359 = vadd.xlane.f32.xlu1 %v1358_v9 }
 0x6f5   : > { %1513 = vrot.lane.b32.xlu1 %v2831_v19, %s2498_s3 }
 0x702   : > { %v1269_v12 = vpop.f32.mrf.mxu1 }
 0x703   : > { %v1273_v13 = vadd.f32 %v1269_v12, %v1033_v11 }
 0x704   : > { %v2068_v14 = vpop.f32.mrf.mxu1 }
 0x76d   : > { %v1360_v16 = vpop.xlane.xlu1 %1359 }
 0x76e   : > { %2213 = vrcp.f32 %v1360_v16 }
 0x771   : > { %v1514_v19 = vpop.permute.xlu1 %1513 }
 0x77b   : > { %v2214_v17 = vpop.eup %2213 }
 0x77c   : > { %v1362_v18 = vmul.f32 %v2214_v17, %v2212_v8 }
 0x77e   : > { %2077 = vmatmul.mubr.msk.f32.vlgmr.msra.gmra.mxu1 %vm799_vm2, %v1362_v18 }
 0x77f   : > { %2085 = vmatpush3.xpose.msk.msra.mxu1 %vm799_vm2, %v1516_v15  ;;  %2086 = vmatprep.mubr.msk.f32.mxu1 %vm2495_vm0, %v2494_v0 }
 0x780   : > { %2094 = vmatprep.subr.mxu1 %v2494_v0 }
 0x782   : > { %2087 = vmatmul.mubr.msk.f32.vlgmr.msra.gmra.mxu1 %vm799_vm2, %v1514_v19 }
 0x783   : > { %2096 = vmatprep.mubr.msk.f32.mxu1 %vm2495_vm0, %v2494_v0 }
 0x83e   : > { %v1435_v21 = vpop.f32.mrf.mxu1 }
 0x83f   : > { %2082 = vmatmul.mubr.msk.f32.vlgmr.msra.gmra.mxu0 %vm799_vm2, %v1435_v21 }
 0x840   : > { %v2078_v22 = vpop.f32.mrf.mxu1  ;;  %2091 = vmatprep.mubr.msk.f32.mxu0 %vm2495_vm0, %v2494_v0  ;;  %v791_v0 = vld [vmem:[#allocation13 + $0x18] sm:$0xff] }
 0x841   : > { %2095 = vmatpush3.msra.mxu1 %v791_v0 }
 0x842   : > { %v1587_v23 = vpop.f32.mrf.mxu1 }
 0x843   : > { %v1591_v24 = vsel %vm799_vm2, %v1587_v23, -inf }
 0x844   : > { %1592 = vmax.xlane.f32.xlu0 %v1591_v24  ;;  %v2088_v25 = vpop.f32.mrf.mxu1 }
 0x85a   : > { %1602 = vrot.lane.b32.xlu0 %v2858_v35, %s2498_s3 }
 0x8cd   : > { %v1593_v26 = vpop.xlane.xlu0 %1592 }
 0x8ce   : > { %v1594_v27 = vsub.f32 %v1587_v23, %v1593_v26 }
 0x8d0   : > { %v1595_v28 = vmul.f32 1.442695, %v1594_v27 }
 0x8d1   : > { %v1603_v29 = vpop.permute.xlu0 %1602 }
 0x8d2   : > { %2215 = vpow2.f32 %v1595_v28  ;;  %2090 = vmatpush3.msra.mxu0 %v1603_v29 }
 0x8df   : > { %v2216_v30 = vpop.eup %2215 }
 0x8e0   : > { %v1597_v31 = vsel %vm799_vm2, %v2216_v30, 0.0 }
 0x8e1   : > { %1598 = vadd.xlane.f32.xlu1 %v1597_v31 }
 0x8ff   : > { %v1508_v32 = vpop.f32.mrf.mxu0 }
 0x900   : > { %v1512_v33 = vadd.f32 %v1508_v32, %v1273_v13 }
 0x901   : > { %v2083_v34 = vpop.f32.mrf.mxu0 }
 0x96a   : > { %v1599_v36 = vpop.xlane.xlu1 %1598 }
 0x96b   : > { %2217 = vrcp.f32 %v1599_v36 }
 0x978   : > { %v2218_v35 = vpop.eup %2217 }
 0x979   : > { %v1601_v37 = vmul.f32 %v2218_v35, %v2216_v30 }
 0x97b   : > { %2092 = vmatmul.mubr.msk.f32.vlgmr.msra.gmra.mxu0 %vm799_vm2, %v1601_v37 }
 0xa3b   : > { %v1674_v38 = vpop.f32.mrf.mxu0 }
 0xa3c   : > { %2097 = vmatmul.mubr.msk.f32.vlgmr.msra.gmra.mxu1 %vm799_vm2, %v1674_v38 }
 0xa3d   : > { %v2093_v39 = vpop.f32.mrf.mxu0 }
 0xafc   : > { %v1747_v40 = vpop.f32.mrf.mxu1 }
 0xafd   : > { %v1751_v41 = vadd.f32 %v1747_v40, %v1512_v33 }
 0xafe   : > { %v2098_v42 = vpop.f32.mrf.mxu1 }
 0xaff   : > { %1752 = vst.msk [vmem:[%s530_s21] sm:$0xff] %vm545_vm1, %v1751_v41 }
 0xb00   : > { %2420 = shalt.err (!%p2417_p7)
}
 0xb01   : > { %s2421_s5 = scalar_lea.hbm %s2927_s22, 128  ;;  %s2425_s30 = scalar_lea.hbm %s3035_s28, 256 }
 0xb02   : > { %p2422_p3 = scmp.ne.s32.totalorder %s2927_s22, %s2421_s5  ;;  %p2426_p6 = scmp.lt.s32.totalorder %s2927_s22, %s3035_s28 }
 0xb03   : > { %p2427_p9 = scmp.lt.s32.totalorder %s2425_s30, %s2421_s5 }
 0xb04   : > { %p2423_p12 = pnand %p2422_p3, %p3036_p1 }
 0xb05   : > { %p2428_p2 = por %p2427_p9, %p2426_p6 }
 0xb06   : > { %p2424_p13 = pneg %p2423_p12 }
 0xb08   : > { %p2429_p5 = pnand %p2428_p2, %p2424_p13 }
 0xb0a   : > { %2432 = shalt.err (!%p2429_p5)
}
 0xb0b   : > { %2121 = dma.vmem_to_hbm [thread:$0]  (%p3036_p1), %s1768_s1, 128, %s2927_s22, %s1754_s13  }
 0xb0c PF: > { %s3037_s3 = sld [smem:[#allocation20_spill]] }
 0xb0d   : > { %s3038_s16 = sld [smem:[#allocation25_spill]] }
 0xb0e   : > { %s3039_s25 = sld [smem:[#allocation21_spill]] }
 0xb12   : > { %s1779_s12 = sand.u32 1, %s3037_s3  }
 0xb13   : > { %p3040_p8 = scmp.ne.s32.totalorder %s3038_s16, 0  ;;  %s1780_s21 = scalar_lea.sflag [#allocation4], %s1779_s12 }
 0xb14   : > { %p3041_p10 = scmp.ge.s32.totalorder %s3039_s25, 2 }
 0xb16   : > { %p2147_p11 = pnand %p3041_p10, %p3040_p8 }
 0xb18   : > { %p2148_p0 = pneg %p2147_p11 }
 0xb1a   : > { %2466 = dma.done.wait (%p2148_p0), %s1780_s21, 128  }
 0xb1b   : > { %2468 = vsyncadd (%p2148_p0), %s1780_s21, 4294967168  ;;  %s3042_s20 = sld [smem:[#allocation22_spill]]  ;;  %s3044_s17 = smov %s2475_s18 }
 0xb1c   : > { %s3043_s24 = sld [smem:[#allocation23_spill]]  ;;  %s3045_s18 = smov %s2479_s19 }
 0xb21   : > { %p29_p4 = scmp.ge.s32.totalorder %s3042_s20, 4  }
 0xb22   : > { %s3046_s19 = smov %s3043_s24 }
 0xb23   :  { %31 = sbr.rel (!%p29_p4) target bundleno = 15 (0xf), region = 149 }
 0xb28   :  { %1785 = vsyncpa [#allocation3], 1 }
 0xb29   :  { %1787 = vsyncpa [#allocation3 + $0x1], 1 }
 0xb2a   :  { %1788 = vsyncpa [#allocation6], 1 }
 0xb2b   :  { %1790 = vsyncpa [#allocation6 + $0x1], 1 }
 0xb2c   :  { %1791 = vsyncpa [#allocation9], 1 }
 0xb2d   :  { %1792 = vsyncpa [#allocation12], 1 }
 0xb2e   :  { %1793 = vsyncpa [#allocation4], 1 }
 0xb2f   :  { %1795 = vsyncpa [#allocation4 + $0x1], 1 }

</bundles_post_ra>
